<compile_context>
chip_gen: v7x
topology: tpu7x:2x2x1
jax: 0.10.0
libtpu: 0.0.40
codegen_flags: <defaults>
</compile_context>

<pallas_src>
import functools
import math

import jax
import jax.numpy as jnp
from jax.experimental import pallas as pl
from jax.experimental.pallas import tpu as pltpu


_GELU_C = math.sqrt(2.0 / math.pi)          # sqrt(2/pi)
_GELU_C2 = _GELU_C * 0.044715               # folded constant (one fewer vmul)


def _round_up(v, m):
    return ((v + m - 1) // m) * m


def _sublane(dtype):
    itemsize = jnp.dtype(dtype).itemsize
    return {4: 8, 2: 16, 1: 32}.get(itemsize, 8)


# ---------------------------------------------------------------------------
# Fused kernel: for each layer l:  x = GELU(x @ W[l] + b[l]) (+ x if residual)
# GELU is the book's tanh approximation:
#   0.5 * y * (1 + tanh( sqrt(2/pi) * (y + 0.044715 * y^3) ))
# ---------------------------------------------------------------------------
def _fused_mlp_kernel(x_ref, w_ref, b_ref, o_ref, *, residual_flags, mxu_dtype):
    x = x_ref[...].astype(jnp.float32)                       # activation in f32 vregs

    for l, residual in enumerate(residual_flags):            # static unroll (5 layers)
        # bf16 operands into the MXU, f32 accumulation.
        y = jnp.dot(x.astype(mxu_dtype), w_ref[l],
                    preferred_element_type=jnp.float32)      # [TB, F]
        y = y + b_ref[l].astype(jnp.float32)                 # [1, F] broadcast
        y2 = y * y                                            # reuse y^2
        g = 0.5 * y * (1.0 + jnp.tanh(_GELU_C * y + _GELU_C2 * (y * y2)))
        x = x + g if residual else g                          # shortcut (f32)

    o_ref[...] = x.astype(o_ref.dtype)


# ---------------------------------------------------------------------------
# One-time parameter packing (hoisted out of the per-step forward)
# ---------------------------------------------------------------------------
def init_params(layer_sizes, key):
    """Deterministic init mimicking nn.Linear's default U(-1/sqrt(fan_in), +)."""
    params = []
    for i in range(len(layer_sizes) - 1):
        din, dout = layer_sizes[i], layer_sizes[i + 1]
        key, kw, kb = jax.random.split(key, 3)
        bound = 1.0 / math.sqrt(din)
        # stored as [in, out] (transpose of PyTorch's [out, in]) -> x @ W
        w = jax.random.uniform(kw, (din, dout), jnp.float32, -bound, bound)
        b = jax.random.uniform(kb, (dout,), jnp.float32, -bound, bound)
        params.append((w, b))
    return params


def pack_params(params, mxu_dtype=jnp.bfloat16):
    """Pad every layer to lane-dense 128 width and stack. Call ONCE."""
    L = len(params)
    dims = [params[0][0].shape[0]] + [w.shape[1] for (w, _) in params]
    F = _round_up(max(dims), 128)
    w_stack = jnp.zeros((L, F, F), mxu_dtype)
    b_stack = jnp.zeros((L, 1, F), jnp.float32)
    for l, (w, b) in enumerate(params):
        din, dout = w.shape
        w_stack = w_stack.at[l, :din, :dout].set(w.astype(mxu_dtype))
        b_stack = b_stack.at[l, 0, :dout].set(b.astype(jnp.float32))
    shape_match = tuple(w.shape[0] == w.shape[1] for (w, _) in params)
    return w_stack, b_stack, shape_match, tuple(dims)


# ---------------------------------------------------------------------------
# Module-equivalent forward (one fused pallas_call)
# ---------------------------------------------------------------------------
@functools.partial(jax.jit, static_argnames=("residual_flags", "dout_last"))
def example_deep_nn_forward(x, w_stack, b_stack, *, residual_flags, dout_last):
    B, din0 = x.shape
    L, F, _ = w_stack.shape
    dtype = x.dtype

    # Batch pad only to the sublane granularity (no forced 128-row pad).
    sub = _sublane(dtype)
    Bp = _round_up(max(B, sub), sub)
    if Bp <= 512:
        TB = Bp                                    # single tile, grid=(1,)
    else:
        TB = 512                                   # batch-parallel tiles (v7x 2 TCs)
        Bp = _round_up(Bp, TB)

    # Single cheap pad per call; weights/biases were packed once, outside.
    xp = jnp.zeros((Bp, F), dtype).at[:B, :din0].set(x)

    isz = lambda d: jnp.dtype(d).itemsize
    # weights + biases + double-buffered x/out tiles, with headroom.
    vmem_bytes = 2 * (w_stack.size * isz(w_stack.dtype)
                      + b_stack.size * isz(b_stack.dtype)
                      + 2 * TB * F * isz(dtype))
    vmem_limit = max(4 * 1024 * 1024, int(1.5 * vmem_bytes))

    out_padded = pl.pallas_call(
        functools.partial(_fused_mlp_kernel,
                          residual_flags=residual_flags,
                          mxu_dtype=w_stack.dtype),
        out_shape=jax.ShapeDtypeStruct((Bp, F), dtype),
        grid=(Bp // TB,),
        in_specs=[
            pl.BlockSpec((TB, F), lambda i: (i, 0)),
            pl.BlockSpec((L, F, F), lambda i: (0, 0, 0)),     # weights resident
            pl.BlockSpec((L, 1, F), lambda i: (0, 0, 0)),
        ],
        out_specs=pl.BlockSpec((TB, F), lambda i: (i, 0)),
        cost_estimate=pl.CostEstimate(
            flops=2 * L * Bp * F * F + 10 * L * Bp * F,
            transcendentals=L * Bp * F,
            bytes_accessed=(2 * Bp * F * isz(dtype)
                            + L * F * F * isz(w_stack.dtype)
                            + L * F * isz(b_stack.dtype)),
        ),
        compiler_params=pltpu.CompilerParams(
            dimension_semantics=("parallel",),
            vmem_limit_bytes=vmem_limit,
        ),
    )(xp, w_stack, b_stack)

    return out_padded[:B, :dout_last]


# Pure-JAX reference (mirrors the bf16-operand / f32-accumulate dot).
def _reference_forward(x, params, use_shortcut, mxu_dtype=jnp.bfloat16):
    for (w, b) in params:
        y = jnp.dot(x.astype(mxu_dtype), w.astype(mxu_dtype),
                    preferred_element_type=jnp.float32)
        y = y + b.astype(jnp.float32)
        g = 0.5 * y * (1.0 + jnp.tanh(_GELU_C * (y + 0.044715 * y ** 3)))
        if use_shortcut and g.shape == x.shape:
            x = x + g
        else:
            x = g
    return x


if __name__ == "__main__":
    # Small shapes: batch=8, hidden=32, final layer narrows to 16 so the last
    # block exercises the "shapes differ -> no shortcut" branch.
    layer_sizes = [32, 32, 32, 32, 32, 16]
    use_shortcut = True

    key = jax.random.PRNGKey(0)
    key, kx = jax.random.split(key)
    x = jax.random.normal(kx, (8, layer_sizes[0]), jnp.float32)
    params = init_params(layer_sizes, key)

    # One-time packing (hoisted out of the forward, per perf review).
    w_stack, b_stack, shape_match, dims = pack_params(params)
    residual_flags = tuple(bool(use_shortcut) and m for m in shape_match)

    out = example_deep_nn_forward(
        x, w_stack, b_stack,
        residual_flags=residual_flags, dout_last=dims[-1])
    out = jax.block_until_ready(out)

    ref = _reference_forward(x, params, use_shortcut)
    assert out.shape == (8, layer_sizes[-1])
    assert jnp.allclose(out, ref, atol=1e-3, rtol=1e-3), float(
        jnp.max(jnp.abs(out - ref)))

    print("KERNEL_OK")
</pallas_src>

<mosaic_0001>
module attributes {stable_mosaic.version = 11 : i64} {
  func.func @_fused_mlp_kernel(%arg0: i32, %arg1: memref<8x128xf32, #tpu.memory_space<vmem>>, %arg2: memref<5x128x128xbf16, #tpu.memory_space<vmem>>, %arg3: memref<5x1x128xf32, #tpu.memory_space<vmem>>, %arg4: memref<8x128xf32, #tpu.memory_space<vmem>>) attributes {dimension_semantics = [#tpu.dimension_semantics<parallel>], iteration_bounds = array<i64: 1>, scalar_prefetch = 0 : i64, scratch_operands = 0 : i64, tpu.core_type = #tpu.core_type<tc>, window_params = [{transform_indices = @transform_0, window_bounds = array<i64: 8, 128>}, {pipeline_mode = #tpu.pipeline_mode<synchronous>, transform_indices = @transform_1, window_bounds = array<i64: 5, 128, 128>}, {pipeline_mode = #tpu.pipeline_mode<synchronous>, transform_indices = @transform_2, window_bounds = array<i64: 5, 1, 128>}, {transform_indices = @transform_3, window_bounds = array<i64: 8, 128>}]} {
    %c0 = arith.constant 0 : index
    %c0_0 = arith.constant 0 : index
    %0 = vector.load %arg1[%c0, %c0_0] : memref<8x128xf32, #tpu.memory_space<vmem>>, vector<8x128xf32>
    %1 = arith.truncf %0 : vector<8x128xf32> to vector<8x128xbf16>
    %c0_1 = arith.constant 0 : index
    %c0_2 = arith.constant 0 : index
    %c0_3 = arith.constant 0 : index
    %2 = vector.load %arg2[%c0_1, %c0_2, %c0_3] : memref<5x128x128xbf16, #tpu.memory_space<vmem>>, vector<1x128x128xbf16>
    %3 = vector.shape_cast %2 : vector<1x128x128xbf16> to vector<128x128xbf16>
    %cst = arith.constant dense<0.000000e+00> : vector<8x128xf32>
    %4 = tpu.matmul %1, %3, %cst {dimension_numbers = #tpu.dot_dimension_numbers<[1], [0], [0], [1], [0, 0, 1, 1], [], []>} : vector<8x128xbf16>, vector<128x128xbf16>, vector<8x128xf32> -> vector<8x128xf32>
    %c0_4 = arith.constant 0 : index
    %c0_5 = arith.constant 0 : index
    %c0_6 = arith.constant 0 : index
    %5 = vector.load %arg3[%c0_4, %c0_5, %c0_6] : memref<5x1x128xf32, #tpu.memory_space<vmem>>, vector<1x1x128xf32>
    %6 = vector.shape_cast %5 : vector<1x1x128xf32> to vector<1x128xf32>
    %7 = vector.broadcast %6 : vector<1x128xf32> to vector<8x128xf32>
    %8 = arith.addf %4, %7 : vector<8x128xf32>
    %9 = arith.mulf %8, %8 : vector<8x128xf32>
    %cst_7 = arith.constant 5.000000e-01 : f32
    %10 = vector.broadcast %cst_7 : f32 to vector<8x128xf32>
    %11 = arith.mulf %10, %8 : vector<8x128xf32>
    %cst_8 = arith.constant 0.797884583 : f32
    %12 = vector.broadcast %cst_8 : f32 to vector<8x128xf32>
    %13 = arith.mulf %12, %8 : vector<8x128xf32>
    %14 = arith.mulf %8, %9 : vector<8x128xf32>
    %cst_9 = arith.constant 0.0356774069 : f32
    %15 = vector.broadcast %cst_9 : f32 to vector<8x128xf32>
    %16 = arith.mulf %15, %14 : vector<8x128xf32>
    %17 = arith.addf %13, %16 : vector<8x128xf32>
    %18 = math.tanh %17 : vector<8x128xf32>
    %cst_10 = arith.constant 1.000000e+00 : f32
    %19 = vector.broadcast %cst_10 : f32 to vector<8x128xf32>
    %20 = arith.addf %19, %18 : vector<8x128xf32>
    %21 = arith.mulf %11, %20 : vector<8x128xf32>
    %22 = arith.addf %0, %21 : vector<8x128xf32>
    %23 = arith.truncf %22 : vector<8x128xf32> to vector<8x128xbf16>
    %c1 = arith.constant 1 : index
    %c0_11 = arith.constant 0 : index
    %c0_12 = arith.constant 0 : index
    %24 = vector.load %arg2[%c1, %c0_11, %c0_12] : memref<5x128x128xbf16, #tpu.memory_space<vmem>>, vector<1x128x128xbf16>
    %25 = vector.shape_cast %24 : vector<1x128x128xbf16> to vector<128x128xbf16>
    %cst_13 = arith.constant dense<0.000000e+00> : vector<8x128xf32>
    %26 = tpu.matmul %23, %25, %cst_13 {dimension_numbers = #tpu.dot_dimension_numbers<[1], [0], [0], [1], [0, 0, 1, 1], [], []>} : vector<8x128xbf16>, vector<128x128xbf16>, vector<8x128xf32> -> vector<8x128xf32>
    %c1_14 = arith.constant 1 : index
    %c0_15 = arith.constant 0 : index
    %c0_16 = arith.constant 0 : index
    %27 = vector.load %arg3[%c1_14, %c0_15, %c0_16] : memref<5x1x128xf32, #tpu.memory_space<vmem>>, vector<1x1x128xf32>
    %28 = vector.shape_cast %27 : vector<1x1x128xf32> to vector<1x128xf32>
    %29 = vector.broadcast %28 : vector<1x128xf32> to vector<8x128xf32>
    %30 = arith.addf %26, %29 : vector<8x128xf32>
    %31 = arith.mulf %30, %30 : vector<8x128xf32>
    %cst_17 = arith.constant 5.000000e-01 : f32
    %32 = vector.broadcast %cst_17 : f32 to vector<8x128xf32>
    %33 = arith.mulf %32, %30 : vector<8x128xf32>
    %cst_18 = arith.constant 0.797884583 : f32
    %34 = vector.broadcast %cst_18 : f32 to vector<8x128xf32>
    %35 = arith.mulf %34, %30 : vector<8x128xf32>
    %36 = arith.mulf %30, %31 : vector<8x128xf32>
    %cst_19 = arith.constant 0.0356774069 : f32
    %37 = vector.broadcast %cst_19 : f32 to vector<8x128xf32>
    %38 = arith.mulf %37, %36 : vector<8x128xf32>
    %39 = arith.addf %35, %38 : vector<8x128xf32>
    %40 = math.tanh %39 : vector<8x128xf32>
    %cst_20 = arith.constant 1.000000e+00 : f32
    %41 = vector.broadcast %cst_20 : f32 to vector<8x128xf32>
    %42 = arith.addf %41, %40 : vector<8x128xf32>
    %43 = arith.mulf %33, %42 : vector<8x128xf32>
    %44 = arith.addf %22, %43 : vector<8x128xf32>
    %45 = arith.truncf %44 : vector<8x128xf32> to vector<8x128xbf16>
    %c2 = arith.constant 2 : index
    %c0_21 = arith.constant 0 : index
    %c0_22 = arith.constant 0 : index
    %46 = vector.load %arg2[%c2, %c0_21, %c0_22] : memref<5x128x128xbf16, #tpu.memory_space<vmem>>, vector<1x128x128xbf16>
    %47 = vector.shape_cast %46 : vector<1x128x128xbf16> to vector<128x128xbf16>
    %cst_23 = arith.constant dense<0.000000e+00> : vector<8x128xf32>
    %48 = tpu.matmul %45, %47, %cst_23 {dimension_numbers = #tpu.dot_dimension_numbers<[1], [0], [0], [1], [0, 0, 1, 1], [], []>} : vector<8x128xbf16>, vector<128x128xbf16>, vector<8x128xf32> -> vector<8x128xf32>
    %c2_24 = arith.constant 2 : index
    %c0_25 = arith.constant 0 : index
    %c0_26 = arith.constant 0 : index
    %49 = vector.load %arg3[%c2_24, %c0_25, %c0_26] : memref<5x1x128xf32, #tpu.memory_space<vmem>>, vector<1x1x128xf32>
    %50 = vector.shape_cast %49 : vector<1x1x128xf32> to vector<1x128xf32>
    %51 = vector.broadcast %50 : vector<1x128xf32> to vector<8x128xf32>
    %52 = arith.addf %48, %51 : vector<8x128xf32>
    %53 = arith.mulf %52, %52 : vector<8x128xf32>
    %cst_27 = arith.constant 5.000000e-01 : f32
    %54 = vector.broadcast %cst_27 : f32 to vector<8x128xf32>
    %55 = arith.mulf %54, %52 : vector<8x128xf32>
    %cst_28 = arith.constant 0.797884583 : f32
    %56 = vector.broadcast %cst_28 : f32 to vector<8x128xf32>
    %57 = arith.mulf %56, %52 : vector<8x128xf32>
    %58 = arith.mulf %52, %53 : vector<8x128xf32>
    %cst_29 = arith.constant 0.0356774069 : f32
    %59 = vector.broadcast %cst_29 : f32 to vector<8x128xf32>
    %60 = arith.mulf %59, %58 : vector<8x128xf32>
    %61 = arith.addf %57, %60 : vector<8x128xf32>
    %62 = math.tanh %61 : vector<8x128xf32>
    %cst_30 = arith.constant 1.000000e+00 : f32
    %63 = vector.broadcast %cst_30 : f32 to vector<8x128xf32>
    %64 = arith.addf %63, %62 : vector<8x128xf32>
    %65 = arith.mulf %55, %64 : vector<8x128xf32>
    %66 = arith.addf %44, %65 : vector<8x128xf32>
    %67 = arith.truncf %66 : vector<8x128xf32> to vector<8x128xbf16>
    %c3 = arith.constant 3 : index
    %c0_31 = arith.constant 0 : index
    %c0_32 = arith.constant 0 : index
    %68 = vector.load %arg2[%c3, %c0_31, %c0_32] : memref<5x128x128xbf16, #tpu.memory_space<vmem>>, vector<1x128x128xbf16>
    %69 = vector.shape_cast %68 : vector<1x128x128xbf16> to vector<128x128xbf16>
    %cst_33 = arith.constant dense<0.000000e+00> : vector<8x128xf32>
    %70 = tpu.matmul %67, %69, %cst_33 {dimension_numbers = #tpu.dot_dimension_numbers<[1], [0], [0], [1], [0, 0, 1, 1], [], []>} : vector<8x128xbf16>, vector<128x128xbf16>, vector<8x128xf32> -> vector<8x128xf32>
    %c3_34 = arith.constant 3 : index
    %c0_35 = arith.constant 0 : index
    %c0_36 = arith.constant 0 : index
    %71 = vector.load %arg3[%c3_34, %c0_35, %c0_36] : memref<5x1x128xf32, #tpu.memory_space<vmem>>, vector<1x1x128xf32>
    %72 = vector.shape_cast %71 : vector<1x1x128xf32> to vector<1x128xf32>
    %73 = vector.broadcast %72 : vector<1x128xf32> to vector<8x128xf32>
    %74 = arith.addf %70, %73 : vector<8x128xf32>
    %75 = arith.mulf %74, %74 : vector<8x128xf32>
    %cst_37 = arith.constant 5.000000e-01 : f32
    %76 = vector.broadcast %cst_37 : f32 to vector<8x128xf32>
    %77 = arith.mulf %76, %74 : vector<8x128xf32>
    %cst_38 = arith.constant 0.797884583 : f32
    %78 = vector.broadcast %cst_38 : f32 to vector<8x128xf32>
    %79 = arith.mulf %78, %74 : vector<8x128xf32>
    %80 = arith.mulf %74, %75 : vector<8x128xf32>
    %cst_39 = arith.constant 0.0356774069 : f32
    %81 = vector.broadcast %cst_39 : f32 to vector<8x128xf32>
    %82 = arith.mulf %81, %80 : vector<8x128xf32>
    %83 = arith.addf %79, %82 : vector<8x128xf32>
    %84 = math.tanh %83 : vector<8x128xf32>
    %cst_40 = arith.constant 1.000000e+00 : f32
    %85 = vector.broadcast %cst_40 : f32 to vector<8x128xf32>
    %86 = arith.addf %85, %84 : vector<8x128xf32>
    %87 = arith.mulf %77, %86 : vector<8x128xf32>
    %88 = arith.addf %66, %87 : vector<8x128xf32>
    %89 = arith.truncf %88 : vector<8x128xf32> to vector<8x128xbf16>
    %c4 = arith.constant 4 : index
    %c0_41 = arith.constant 0 : index
    %c0_42 = arith.constant 0 : index
    %90 = vector.load %arg2[%c4, %c0_41, %c0_42] : memref<5x128x128xbf16, #tpu.memory_space<vmem>>, vector<1x128x128xbf16>
    %91 = vector.shape_cast %90 : vector<1x128x128xbf16> to vector<128x128xbf16>
    %cst_43 = arith.constant dense<0.000000e+00> : vector<8x128xf32>
    %92 = tpu.matmul %89, %91, %cst_43 {dimension_numbers = #tpu.dot_dimension_numbers<[1], [0], [0], [1], [0, 0, 1, 1], [], []>} : vector<8x128xbf16>, vector<128x128xbf16>, vector<8x128xf32> -> vector<8x128xf32>
    %c4_44 = arith.constant 4 : index
    %c0_45 = arith.constant 0 : index
    %c0_46 = arith.constant 0 : index
    %93 = vector.load %arg3[%c4_44, %c0_45, %c0_46] : memref<5x1x128xf32, #tpu.memory_space<vmem>>, vector<1x1x128xf32>
    %94 = vector.shape_cast %93 : vector<1x1x128xf32> to vector<1x128xf32>
    %95 = vector.broadcast %94 : vector<1x128xf32> to vector<8x128xf32>
    %96 = arith.addf %92, %95 : vector<8x128xf32>
    %97 = arith.mulf %96, %96 : vector<8x128xf32>
    %cst_47 = arith.constant 5.000000e-01 : f32
    %98 = vector.broadcast %cst_47 : f32 to vector<8x128xf32>
    %99 = arith.mulf %98, %96 : vector<8x128xf32>
    %cst_48 = arith.constant 0.797884583 : f32
    %100 = vector.broadcast %cst_48 : f32 to vector<8x128xf32>
    %101 = arith.mulf %100, %96 : vector<8x128xf32>
    %102 = arith.mulf %96, %97 : vector<8x128xf32>
    %cst_49 = arith.constant 0.0356774069 : f32
    %103 = vector.broadcast %cst_49 : f32 to vector<8x128xf32>
    %104 = arith.mulf %103, %102 : vector<8x128xf32>
    %105 = arith.addf %101, %104 : vector<8x128xf32>
    %106 = math.tanh %105 : vector<8x128xf32>
    %cst_50 = arith.constant 1.000000e+00 : f32
    %107 = vector.broadcast %cst_50 : f32 to vector<8x128xf32>
    %108 = arith.addf %107, %106 : vector<8x128xf32>
    %109 = arith.mulf %99, %108 : vector<8x128xf32>
    %c0_51 = arith.constant 0 : index
    %c0_52 = arith.constant 0 : index
    %110 = vector.load %arg4[%c0_51, %c0_52] : memref<8x128xf32, #tpu.memory_space<vmem>>, vector<8x128xf32>
    tpu.vector_store %arg4[%c0_51, %c0_52], %109 {strides = array<i32>} : memref<8x128xf32, #tpu.memory_space<vmem>>, vector<8x128xf32>,
    return
  }
  func.func @transform_0(%arg0: i32) -> (i32, i32) {
    %c0_i32 = arith.constant 0 : i32
    %c0_i32_0 = arith.constant 0 : i32
    return %arg0, %c0_i32 : i32, i32
  }
  func.func @transform_1(%arg0: i32) -> (i32, i32, i32) {
    %c0_i32 = arith.constant 0 : i32
    %c0_i32_0 = arith.constant 0 : i32
    %c0_i32_1 = arith.constant 0 : i32
    %c0_i32_2 = arith.constant 0 : i32
    return %c0_i32, %c0_i32_0, %c0_i32_1 : i32, i32, i32
  }
  func.func @transform_2(%arg0: i32) -> (i32, i32, i32) {
    %c0_i32 = arith.constant 0 : i32
    %c0_i32_0 = arith.constant 0 : i32
    %c0_i32_1 = arith.constant 0 : i32
    %c0_i32_2 = arith.constant 0 : i32
    return %c0_i32, %c0_i32_0, %c0_i32_1 : i32, i32, i32
  }
  func.func @transform_3(%arg0: i32) -> (i32, i32) {
    %c0_i32 = arith.constant 0 : i32
    %c0_i32_0 = arith.constant 0 : i32
    return %arg0, %c0_i32 : i32, i32
  }
}

</mosaic_0001>

<bundles_post_ra>
// kernel: example_deep_nn_forward.1
= control target key start
LH: loop header
LB: loop body
LE: loop exit
PB: predicated region body
PF: predicated region fallthrough
CT: control target
= control target key end

     0   :  { %8 = vsyncpa [#allocation3], 0  ;;  %s1080_s0 = inlined_call_operand.vmem [shape: f32[8,128], index: 0, kind: input, shape index: {}]   ;;  %s1081_s1 = inlined_call_operand.hbm [shape: bf16[5,128,128], index: 1, kind: input, shape index: {}]   ;;  %s1082_s2 = inlined_call_operand.vmem [shape: f32[5,1,128], index: 2, kind: input, shape index: {}]   ;;  %s1083_s3 = inlined_call_operand.hbm [shape: f32[8,128], index: 3, kind: output, shape index: {}]  }
   0x1   :  { %9 = vsyncpa [#allocation4], 0  ;;  %s962_s12 = smov [#allocation2]   ;;  %s914_s16 = scalar_lea.hbm %s1081_s1, 5120 }
   0x2   :  { %s17_s13 = sshll.u32 %s962_s12, 4  ;;  %p915_p0 = scmp.ne.s32.totalorder %s1081_s1, %s914_s16  ;;  %s18_s13 = int_to_ptr.vmem [resolvable:$true] %s17_s13 }
   0x3   :  { %p918_p1 = scmp.lt.u32.totalorder %s914_s16, %s1081_s1 }
   0x5   :  { %p920_p2 = pnand %p918_p1, %p915_p0 }
   0x7   :  { %923 = shalt.err (!%p920_p2)
}
   0x8   :  { %s924_s21 = scalar_lea.vmem %s18_s13, 5120  ;;  %p929_p4 = scmp.lt.s32.totalorder %s18_s13, %s18_s13 }
   0x9   :  { %p925_p3 = scmp.ne.s32.totalorder %s18_s13, %s924_s21  ;;  %p930_p5 = scmp.lt.s32.totalorder %s924_s21, %s924_s21 }
   0xb   :  { %p931_p6 = por %p930_p5, %p929_p4 }
   0xd   :  { %p932_p7 = pnand %p931_p6, %p925_p3 }
   0xf   :  { %935 = shalt.err (!%p932_p7)
}
  0x10   :  { %s963_s22 = smov 64   ;;  %s964_s23 = smov 4  }
  0x11   :  { %23 = dma.hbm_to_vmem [thread:$0]  %s1081_s1, 5120, %s18_s13, [#allocation3], %s963_s22, %s963_s22, %s964_s23  }
  0x12   :  { %958 = dma.done.wait [#allocation3], 5120  }
  0x13   :  { %959 = vsyncadd [#allocation3], 4294962176  ;;  %v965_v0 = vmov 0.0   ;;  %vm966_vm0 = vmmov 0   ;;  %v864_v1 = vld [vmem:[#allocation2] sm:$0xff]   ;;  %v865_v2 = vld [vmem:[#allocation2 + $0x8] sm:$0xff]  }
  0x14   :  { %758 = vmatprep.subr.bf16.mxu0 %v965_v0  ;;  %774 = vmatprep.mubr.msk.bf16.mxu0 %vm966_vm0, %v965_v0  ;;  %v866_v3 = vld [vmem:[#allocation2 + $0x10] sm:$0xff]   ;;  %v867_v4 = vld [vmem:[#allocation2 + $0x18] sm:$0xff]   ;;  %v872_v5 = vld [vmem:[#allocation2 + $0x40] sm:$0xff]   ;;  %s967_s9 = smov [#allocation5]  }
  0x15   :  { %778 = vmatprep.subr.bf16.mxu1 %v965_v0  ;;  %794 = vmatprep.mubr.msk.bf16.mxu1 %vm966_vm0, %v965_v0  ;;  %v868_v6 = vld [vmem:[#allocation2 + $0x20] sm:$0xff]   ;;  %v869_v7 = vld [vmem:[#allocation2 + $0x28] sm:$0xff]   ;;  %v870_v8 = vld [vmem:[#allocation2 + $0x30] sm:$0xff]   ;;  %s655_s10 = sshll.u32 %s967_s9, 4  ;;  %s656_s10 = int_to_ptr.vmem [resolvable:$true] %s655_s10 }
  0x16   :  { %759 = vmatpush3.bf16.msra.mxu0 %v864_v1  ;;  %779 = vmatpush3.bf16.msra.mxu1 %v872_v5  ;;  %v871_v9 = vld [vmem:[#allocation2 + $0x38] sm:$0xff]   ;;  %v30_v10 = vld [vmem:[%s1080_s0] sm:$0xff]  ;;  %v873_v12 = vld [vmem:[#allocation2 + $0x48] sm:$0xff]   ;;  %p941_p9 = scmp.lt.s32.totalorder %s656_s10, %s656_s10 }
  0x17   :  { %760 = vmatprep.subr.bf16.mxu0 %v965_v0  ;;  %780 = vmatprep.subr.bf16.mxu1 %v965_v0  ;;  %v31_v11 = vpack.c.bf16 %v30_v10, %v30_v10  ;;  %v874_v13 = vld [vmem:[#allocation2 + $0x50] sm:$0xff]   ;;  %v875_v14 = vld [vmem:[#allocation2 + $0x58] sm:$0xff]   ;;  %v876_v15 = vld [vmem:[#allocation2 + $0x60] sm:$0xff]  }
  0x18   :  { %v877_v16 = vld [vmem:[#allocation2 + $0x68] sm:$0xff]   ;;  %v878_v17 = vld [vmem:[#allocation2 + $0x70] sm:$0xff]   ;;  %v879_v18 = vld [vmem:[#allocation2 + $0x78] sm:$0xff]  }
  0x19   :  { %v880_v19 = vld [vmem:[#allocation2 + $0x80] sm:$0xff]   ;;  %v881_v37 = vld [vmem:[#allocation2 + $0x88] sm:$0xff]   ;;  %v882_v38 = vld [vmem:[#allocation2 + $0x90] sm:$0xff]  }
  0x1a   :  { %761 = vmatpush3.bf16.msra.mxu0 %v865_v2  ;;  %781 = vmatpush3.bf16.msra.mxu1 %v873_v12  ;;  %v664_v20 = vld [vmem:[%s1082_s2] ss:$0 sm:$0xff]  ;;  %v883_v39 = vld [vmem:[#allocation2 + $0x98] sm:$0xff]   ;;  %v885_v41 = vld [vmem:[#allocation2 + $0xa8] sm:$0xff]  }
  0x1b   :  { %762 = vmatprep.subr.bf16.mxu0 %v965_v0  ;;  %782 = vmatprep.subr.bf16.mxu1 %v965_v0  ;;  %v884_v40 = vld [vmem:[#allocation2 + $0xa0] sm:$0xff]   ;;  %v886_v42 = vld [vmem:[#allocation2 + $0xb0] sm:$0xff]   ;;  %v887_v43 = vld [vmem:[#allocation2 + $0xb8] sm:$0xff]  }
  0x1c   :  { %v888_v44 = vld [vmem:[#allocation2 + $0xc0] sm:$0xff]   ;;  %v889_v62 = vld [vmem:[#allocation2 + $0xc8] sm:$0xff]   ;;  %v890_v63 = vld [vmem:[#allocation2 + $0xd0] sm:$0xff]  }
  0x1d   :  { %v674_v45 = vld [vmem:[%s1082_s2 + $0x1] ss:$0 sm:$0xff]  ;;  %v891_v1 = vld [vmem:[#allocation2 + $0xd8] sm:$0xff]  }
  0x1e   :  { %763 = vmatpush3.bf16.msra.mxu0 %v866_v3  ;;  %783 = vmatpush3.bf16.msra.mxu1 %v874_v13  ;;  %v892_v2 = vld [vmem:[#allocation2 + $0xe0] sm:$0xff]   ;;  %v893_v3 = vld [vmem:[#allocation2 + $0xe8] sm:$0xff]   ;;  %v895_v5 = vld [vmem:[#allocation2 + $0xf8] sm:$0xff]  }
  0x1f   :  { %764 = vmatprep.subr.bf16.mxu0 %v965_v0  ;;  %784 = vmatprep.subr.bf16.mxu1 %v965_v0 }
  0x22   :  { %765 = vmatpush3.bf16.msra.mxu0 %v867_v4  ;;  %785 = vmatpush3.bf16.msra.mxu1 %v875_v14  ;;  %v894_v4 = vld [vmem:[#allocation2 + $0xf0] sm:$0xff]  }
  0x23   :  { %766 = vmatprep.subr.bf16.mxu0 %v965_v0  ;;  %786 = vmatprep.subr.bf16.mxu1 %v965_v0 }
  0x26   :  { %767 = vmatpush3.bf16.msra.mxu0 %v868_v6  ;;  %787 = vmatpush3.bf16.msra.mxu1 %v876_v15  ;;  %v896_v6 = vld [vmem:[#allocation2 + $0x100] sm:$0xff]  }
  0x27   :  { %768 = vmatprep.subr.bf16.mxu0 %v965_v0  ;;  %788 = vmatprep.subr.bf16.mxu1 %v965_v0 }
  0x2a   :  { %769 = vmatpush3.bf16.msra.mxu0 %v869_v7  ;;  %789 = vmatpush3.bf16.msra.mxu1 %v877_v16  ;;  %v684_v7 = vld [vmem:[%s1082_s2 + $0x2] ss:$0 sm:$0xff] }
  0x2b   :  { %770 = vmatprep.subr.bf16.mxu0 %v965_v0  ;;  %790 = vmatprep.subr.bf16.mxu1 %v965_v0 }
  0x2e   :  { %771 = vmatpush3.bf16.msra.mxu0 %v870_v8  ;;  %791 = vmatpush3.bf16.msra.mxu1 %v878_v17 }
  0x2f   :  { %772 = vmatprep.subr.bf16.mxu0 %v965_v0  ;;  %792 = vmatprep.subr.bf16.mxu1 %v965_v0 }
  0x32   :  { %773 = vmatpush3.bf16.msra.mxu0 %v871_v9  ;;  %793 = vmatpush3.bf16.msra.mxu1 %v879_v18 }
  0x33   :  { %798 = vmatprep.subr.bf16.mxu0 %v965_v0  ;;  %818 = vmatprep.subr.bf16.mxu1 %v965_v0 }
  0x35   :  { %775 = vmatmul.mubr.bf16.vlgmr.msra.gmra.mrb[0].mxu0 %v31_v11 }
  0x36   :  { %814 = vmatprep.mubr.msk.bf16.mxu0 %vm966_vm0, %v965_v0  ;;  %799 = vmatpush3.bf16.msra.mxu0 %v880_v19 }
  0x37   :  { %800 = vmatprep.subr.bf16.mxu0 %v965_v0 }
  0x3a   :  { %801 = vmatpush3.bf16.msra.mxu0 %v881_v37 }
  0x3b   :  { %802 = vmatprep.subr.bf16.mxu0 %v965_v0 }
  0x3e   :  { %803 = vmatpush3.bf16.msra.mxu0 %v882_v38 }
  0x3f   :  { %804 = vmatprep.subr.bf16.mxu0 %v965_v0 }
  0x42   :  { %805 = vmatpush3.bf16.msra.mxu0 %v883_v39 }
  0x43   :  { %806 = vmatprep.subr.bf16.mxu0 %v965_v0 }
  0x46   :  { %807 = vmatpush3.bf16.msra.mxu0 %v884_v40 }
  0x47   :  { %808 = vmatprep.subr.bf16.mxu0 %v965_v0 }
  0x4a   :  { %809 = vmatpush3.bf16.msra.mxu0 %v885_v41 }
  0x4b   :  { %810 = vmatprep.subr.bf16.mxu0 %v965_v0 }
  0x4e   :  { %811 = vmatpush3.bf16.msra.mxu0 %v886_v42 }
  0x4f   :  { %812 = vmatprep.subr.bf16.mxu0 %v965_v0 }
  0x52   :  { %813 = vmatpush3.bf16.msra.mxu0 %v887_v43 }
  0x53   :  { %838 = vmatprep.subr.bf16.mxu0 %v965_v0 }
 0x108   :  { %v137_v21 = vpop.f32.mrb[0].mxu0 }
 0x109   :  { %v138_v22 = vadd.f32 %v664_v20, %v137_v21  ;;  %v776_v23 = vpop.f32.mrb[1].mxu0 }
 0x10a   :  { %v140_v24 = vpop.f32.mrb[2].mxu0 }
 0x10b   :  { %v143_v25 = vmul.f32 %v138_v22, %v138_v22  ;;  %v777_v26 = vpop.f32.mrb[3].mxu0  ;;  %v145_v28 = vmul.f32 0.7978846, %v138_v22  ;;  %v144_v32 = vmul.f32 0.5, %v138_v22  ;;  %v897_v24 = vld [vmem:[#allocation2 + $0x108] sm:$0xff]  }
 0x10c   :  { %v899_v26 = vld [vmem:[#allocation2 + $0x118] sm:$0xff]  }
 0x10d   :  { %v146_v27 = vmul.f32 %v143_v25, %v138_v22  ;;  %v898_v25 = vld [vmem:[#allocation2 + $0x110] sm:$0xff]  }
 0x10f   :  { %v147_v29 = vmul.f32 0.035677407, %v146_v27  ;;  %v900_v27 = vld [vmem:[#allocation2 + $0x120] sm:$0xff]  }
 0x111   :  { %v148_v30 = vadd.f32 %v147_v29, %v145_v28  ;;  %v901_v28 = vld [vmem:[#allocation2 + $0x128] sm:$0xff]   ;;  %v902_v29 = vld [vmem:[#allocation2 + $0x130] sm:$0xff]  }
 0x113   :  { %904 = vtanh.f32 %v148_v30  ;;  %v903_v30 = vld [vmem:[#allocation2 + $0x138] sm:$0xff]  }
 0x11d   :  { %v905_v31 = vpop.eup %904 }
 0x11e   :  { %v150_v33 = vadd.f32 1.0, %v905_v31  ;;  %v694_v31 = vld [vmem:[%s1082_s2 + $0x3] ss:$0 sm:$0xff] }
 0x120   :  { %v151_v34 = vmul.f32 %v150_v33, %v144_v32 }
 0x122   :  { %v152_v35 = vadd.f32 %v151_v34, %v30_v10 }
 0x124   :  { %v153_v36 = vpack.c.bf16 %v152_v35, %v152_v35 }
 0x126   :  { %795 = vmatmul.mubr.bf16.vlgmr.msra.gmra.mrb[0].mxu1 %v153_v36 }
 0x127   :  { %834 = vmatprep.mubr.msk.bf16.mxu1 %vm966_vm0, %v965_v0  ;;  %819 = vmatpush3.bf16.msra.mxu1 %v888_v44 }
 0x128   :  { %820 = vmatprep.subr.bf16.mxu1 %v965_v0 }
 0x12b   :  { %821 = vmatpush3.bf16.msra.mxu1 %v889_v62 }
 0x12c   :  { %822 = vmatprep.subr.bf16.mxu1 %v965_v0 }
 0x12f   :  { %823 = vmatpush3.bf16.msra.mxu1 %v890_v63 }
 0x130   :  { %824 = vmatprep.subr.bf16.mxu1 %v965_v0 }
 0x133   :  { %825 = vmatpush3.bf16.msra.mxu1 %v891_v1 }
 0x134   :  { %826 = vmatprep.subr.bf16.mxu1 %v965_v0 }
 0x137   :  { %827 = vmatpush3.bf16.msra.mxu1 %v892_v2 }
 0x138   :  { %828 = vmatprep.subr.bf16.mxu1 %v965_v0 }
 0x13b   :  { %829 = vmatpush3.bf16.msra.mxu1 %v893_v3 }
 0x13c   :  { %830 = vmatprep.subr.bf16.mxu1 %v965_v0 }
 0x13f   :  { %831 = vmatpush3.bf16.msra.mxu1 %v894_v4 }
 0x140   :  { %832 = vmatprep.subr.bf16.mxu1 %v965_v0 }
 0x143   :  { %833 = vmatpush3.bf16.msra.mxu1 %v895_v5 }
 0x1f9   :  { %v261_v46 = vpop.f32.mrb[0].mxu1 }
 0x1fa   :  { %v262_v47 = vadd.f32 %v674_v45, %v261_v46  ;;  %v796_v48 = vpop.f32.mrb[1].mxu1 }
 0x1fb   :  { %v264_v49 = vpop.f32.mrb[2].mxu1 }
 0x1fc   :  { %v267_v50 = vmul.f32 %v262_v47, %v262_v47  ;;  %v797_v51 = vpop.f32.mrb[3].mxu1  ;;  %v269_v53 = vmul.f32 0.7978846, %v262_v47  ;;  %v268_v57 = vmul.f32 0.5, %v262_v47 }
 0x1fe   :  { %v270_v52 = vmul.f32 %v267_v50, %v262_v47  ;;  %v704_v47 = vld [vmem:[%s1082_s2 + $0x4] ss:$0 sm:$0xff]  ;;  %s936_s2 = scalar_lea.vmem %s656_s10, 128 }
 0x1ff   :  { %p937_p8 = scmp.ne.s32.totalorder %s656_s10, %s936_s2  ;;  %p942_p10 = scmp.lt.s32.totalorder %s936_s2, %s936_s2 }
 0x200   :  { %v271_v54 = vmul.f32 0.035677407, %v270_v52 }
 0x201   :  { %p943_p11 = por %p942_p10, %p941_p9 }
 0x202   :  { %v272_v55 = vadd.f32 %v271_v54, %v269_v53 }
 0x203   :  { %p944_p12 = pnand %p943_p11, %p937_p8 }
 0x204   :  { %906 = vtanh.f32 %v272_v55 }
 0x20e   :  { %v907_v56 = vpop.eup %906 }
 0x20f   :  { %v274_v58 = vadd.f32 1.0, %v907_v56 }
 0x211   :  { %v275_v59 = vmul.f32 %v274_v58, %v268_v57 }
 0x213   :  { %v276_v60 = vadd.f32 %v275_v59, %v152_v35 }
 0x215   :  { %v277_v61 = vpack.c.bf16 %v276_v60, %v276_v60 }
 0x217   :  { %815 = vmatmul.mubr.bf16.vlgmr.msra.gmra.mrb[4].mxu0 %v277_v61 }
 0x218   :  { %854 = vmatprep.mubr.msk.bf16.mxu0 %vm966_vm0, %v965_v0  ;;  %839 = vmatpush3.bf16.msra.mxu0 %v896_v6 }
 0x219   :  { %840 = vmatprep.subr.bf16.mxu0 %v965_v0 }
 0x21c   :  { %841 = vmatpush3.bf16.msra.mxu0 %v897_v24 }
 0x21d   :  { %842 = vmatprep.subr.bf16.mxu0 %v965_v0 }
 0x220   :  { %843 = vmatpush3.bf16.msra.mxu0 %v898_v25 }
 0x221   :  { %844 = vmatprep.subr.bf16.mxu0 %v965_v0 }
 0x224   :  { %845 = vmatpush3.bf16.msra.mxu0 %v899_v26 }
 0x225   :  { %846 = vmatprep.subr.bf16.mxu0 %v965_v0 }
 0x228   :  { %847 = vmatpush3.bf16.msra.mxu0 %v900_v27 }
 0x229   :  { %848 = vmatprep.subr.bf16.mxu0 %v965_v0 }
 0x22c   :  { %849 = vmatpush3.bf16.msra.mxu0 %v901_v28 }
 0x22d   :  { %850 = vmatprep.subr.bf16.mxu0 %v965_v0 }
 0x230   :  { %851 = vmatpush3.bf16.msra.mxu0 %v902_v29 }
 0x231   :  { %852 = vmatprep.subr.bf16.mxu0 %v965_v0 }
 0x234   :  { %853 = vmatpush3.bf16.msra.mxu0 %v903_v30 }
 0x2ea   :  { %v385_v8 = vpop.f32.mrb[4].mxu0 }
 0x2eb   :  { %v386_v9 = vadd.f32 %v684_v7, %v385_v8  ;;  %v816_v10 = vpop.f32.mrb[5].mxu0 }
 0x2ec   :  { %v388_v11 = vpop.f32.mrb[6].mxu0 }
 0x2ed   :  { %v391_v12 = vmul.f32 %v386_v9, %v386_v9  ;;  %v817_v13 = vpop.f32.mrb[7].mxu0  ;;  %v393_v15 = vmul.f32 0.7978846, %v386_v9  ;;  %v392_v19 = vmul.f32 0.5, %v386_v9 }
 0x2ef   :  { %v394_v14 = vmul.f32 %v391_v12, %v386_v9 }
 0x2f1   :  { %v395_v16 = vmul.f32 0.035677407, %v394_v14 }
 0x2f3   :  { %v396_v17 = vadd.f32 %v395_v16, %v393_v15 }
 0x2f5   :  { %908 = vtanh.f32 %v396_v17 }
 0x2ff   :  { %v909_v18 = vpop.eup %908 }
 0x300   :  { %v398_v20 = vadd.f32 1.0, %v909_v18 }
 0x302   :  { %v399_v21 = vmul.f32 %v398_v20, %v392_v19 }
 0x304   :  { %v400_v22 = vadd.f32 %v399_v21, %v276_v60 }
 0x306   :  { %v401_v23 = vpack.c.bf16 %v400_v22, %v400_v22 }
 0x308   :  { %835 = vmatmul.mubr.bf16.vlgmr.msra.gmra.mrb[4].mxu1 %v401_v23 }
 0x3db   :  { %v509_v32 = vpop.f32.mrb[4].mxu1 }
 0x3dc   :  { %v510_v33 = vadd.f32 %v694_v31, %v509_v32  ;;  %v836_v34 = vpop.f32.mrb[5].mxu1 }
 0x3dd   :  { %v512_v35 = vpop.f32.mrb[6].mxu1 }
 0x3de   :  { %v515_v36 = vmul.f32 %v510_v33, %v510_v33  ;;  %v837_v37 = vpop.f32.mrb[7].mxu1  ;;  %v517_v39 = vmul.f32 0.7978846, %v510_v33  ;;  %v516_v43 = vmul.f32 0.5, %v510_v33 }
 0x3e0   :  { %v518_v38 = vmul.f32 %v515_v36, %v510_v33 }
 0x3e2   :  { %v519_v40 = vmul.f32 0.035677407, %v518_v38 }
 0x3e4   :  { %v520_v41 = vadd.f32 %v519_v40, %v517_v39 }
 0x3e6   :  { %910 = vtanh.f32 %v520_v41 }
 0x3f0   :  { %v911_v42 = vpop.eup %910 }
 0x3f1   :  { %v522_v44 = vadd.f32 1.0, %v911_v42 }
 0x3f3   :  { %v523_v0 = vmul.f32 %v522_v44, %v516_v43 }
 0x3f5   :  { %v524_v45 = vadd.f32 %v523_v0, %v400_v22 }
 0x3f7   :  { %v525_v46 = vpack.c.bf16 %v524_v45, %v524_v45 }
 0x3f9   :  { %855 = vmatmul.mubr.bf16.vlgmr.msra.gmra.mrb[8].mxu0 %v525_v46 }
 0x4cc   :  { %v633_v48 = vpop.f32.mrb[8].mxu0 }
 0x4cd   :  { %v634_v49 = vadd.f32 %v704_v47, %v633_v48  ;;  %v856_v50 = vpop.f32.mrb[9].mxu0 }
 0x4ce   :  { %v636_v51 = vpop.f32.mrb[10].mxu0 }
 0x4cf   :  { %v639_v52 = vmul.f32 %v634_v49, %v634_v49  ;;  %v857_v53 = vpop.f32.mrb[11].mxu0  ;;  %v641_v55 = vmul.f32 0.7978846, %v634_v49  ;;  %v640_v59 = vmul.f32 0.5, %v634_v49 }
 0x4d1   :  { %v642_v54 = vmul.f32 %v639_v52, %v634_v49 }
 0x4d3   :  { %v643_v56 = vmul.f32 0.035677407, %v642_v54 }
 0x4d5   :  { %v644_v57 = vadd.f32 %v643_v56, %v641_v55 }
 0x4d7   :  { %912 = vtanh.f32 %v644_v57 }
 0x4e1   :  { %v913_v58 = vpop.eup %912 }
 0x4e2   :  { %v646_v60 = vadd.f32 1.0, %v913_v58 }
 0x4e4   :  { %v647_v61 = vmul.f32 %v646_v60, %v640_v59 }
 0x4e6   :  { %648 = vst [vmem:[#allocation5] sm:$0xff] %v647_v61 }
 0x4e7   :  { %947 = shalt.err (!%p944_p12)
}
 0x4e8   :  { %s948_s13 = scalar_lea.hbm %s1083_s3, 128 }
 0x4e9   :  { %p949_p13 = scmp.ne.s32.totalorder %s1083_s3, %s948_s13  ;;  %p952_p0 = scmp.lt.u32.totalorder %s948_s13, %s1083_s3 }
 0x4eb   :  { %p954_p1 = pnand %p952_p0, %p949_p13 }
 0x4ed   :  { %957 = shalt.err (!%p954_p1)
}
 0x4ee   :  { %658 = dma.vmem_to_hbm [thread:$0]  %s656_s10, 128, %s1083_s3, [#allocation4]  }
 0x4ef   :  { %960 = dma.done.wait [#allocation4], 128  }
 0x4f0   :  { %961 = vsyncadd [#allocation4], 4294967168 }
 0x4f1   :  { %662 = vsyncpa [#allocation3], 1 }
 0x4f2   :  { %663 = vsyncpa [#allocation4], 1 }

</bundles_post_ra>
